<compile_context>
chip_gen: v7x
topology: tpu7x:2x2x1
jax: 0.10.0
libtpu: 0.0.40
codegen_flags: <defaults>
</compile_context>

<pallas_src>
import functools

import jax
import jax.numpy as jnp
from jax.experimental import pallas as pl
from jax.experimental.pallas import tpu as pltpu

LANES = 128                      # lane width (last dim of every tile)
TARGET_TILE_BYTES = 4 << 20      # ~4 MiB per input tile (dtype-aware row_tile)
CHUNK_BIG = 256                  # rows per in-kernel chunk (32 f32 vregs/operand)
MAX_CORES = 2                    # leading "parallel" axis (both TCs on v7x)
VMEM_LIMIT_BYTES = 40 << 20      # 16 MiB tiles + headroom; < 64 MiB v7x physical


def _charbonnier_kernel(pred_ref, targ_ref, out_ref, acc_ref, *,
                        eps, row_tile, chunk, unroll, steps_per_core, full_steps):
    c = pl.program_id(0)          # parallel (core-split) axis
    i = pl.program_id(1)          # reduction axis

    @pl.when(i == 0)
    def _init():
        acc_ref[...] = jnp.zeros_like(acc_ref)

    step = c * steps_per_core + i        # UNclamped logical step

    # Steady-state path has NO per-element masks.  Clamped duplicate steps
    # (index_map pinned onto the last real block) are skipped by this scalar
    # guard, so they contribute nothing.
    @pl.when(step < full_steps)
    def _accumulate():
        nchunks = row_tile // chunk

        def body(r, carry):
            r0 = pl.multiple_of(r * chunk, chunk)
            p = pred_ref[pl.ds(r0, chunk), :].astype(jnp.float32)
            t = targ_ref[pl.ds(r0, chunk), :].astype(jnp.float32)
            d = p - t
            e = jnp.sqrt(d * d + jnp.float32(eps))        # sqrt -> EUP slot
            # VPU-only sublane-group fold onto the (8,128) accumulator.
            acc_ref[...] += e.reshape(chunk // 8, 8, LANES).sum(axis=0)
            return carry

        # Chunked accumulation bounds vreg/VMEM pressure regardless of
        # row_tile; partial unroll keeps loop overhead hidden and code small.
        jax.lax.fori_loop(0, nchunks, body, 0, unroll=unroll)

    @pl.when(i == pl.num_programs(1) - 1)
    def _finalize():
        out_ref[...] = acc_ref[...].reshape(1, 8, LANES)


def _plain_charbonnier_sum(p, t, eps):
    d = p.astype(jnp.float32) - t.astype(jnp.float32)
    return jnp.sum(jnp.sqrt(d * d + jnp.float32(eps)))


def charbonnier_loss(pred, target, eps):
    """Pallas TPU implementation of CharbonnierLoss.forward: mean(sqrt((p-t)^2+eps))."""
    assert pred.shape == target.shape
    total = pred.size
    assert total > 0

    # Stream in native dtype when it is a supported TPU float; otherwise f32.
    supported = (jnp.dtype(jnp.float32), jnp.dtype(jnp.bfloat16), jnp.dtype(jnp.float16))
    if pred.dtype != target.dtype or pred.dtype not in supported:
        pred = pred.astype(jnp.float32)
        target = target.astype(jnp.float32)

    p = pred.reshape(-1)
    t = target.reshape(-1)

    # Minimal lane alignment: only totals that are NOT a multiple of 128 pay a
    # pad copy.  Padded zeros each contribute exactly sqrt(eps), which is
    # subtracted analytically below -- so the kernel needs no masking at all.
    n_pad = (-total) % LANES
    if n_pad:
        p = jnp.pad(p, (0, n_pad))
        t = jnp.pad(t, (0, n_pad))
    rows = (total + n_pad) // LANES

    itemsize = p.dtype.itemsize
    row_tile_target = TARGET_TILE_BYTES // (LANES * itemsize)   # 8192 f32 / 16384 bf16

    # Row-tile selection: dtype-aware, a multiple of the chunk size, and never
    # larger than the aligned prefix of `rows`, so the kernel only ever reads
    # FULL blocks.  Leftover rows (< row_tile) go to a tiny jnp tail.
    if rows >= 2048:
        chunk = CHUNK_BIG
        row_tile = min(row_tile_target, (rows // 2048) * 2048)
        unroll = 8            # nchunks is a multiple of 8 by construction
    elif rows >= CHUNK_BIG:
        chunk = CHUNK_BIG
        row_tile = (rows // CHUNK_BIG) * CHUNK_BIG
        unroll = True         # <= 7 chunks, full unroll
    elif rows >= 8:
        chunk = 8
        row_tile = (rows // 8) * 8
        unroll = True         # <= 31 chunks
    else:
        row_tile = 0          # too small for a tile; pure-jnp path

    full_steps = rows // row_tile if row_tile else 0

    if full_steps == 0:
        total_sum = _plain_charbonnier_sum(p, t, eps)
    else:
        ncores = MAX_CORES if full_steps >= MAX_CORES else 1
        steps_per_core = pl.cdiv(full_steps, ncores)
        kernel_rows = full_steps * row_tile

        p2 = p.reshape(rows, LANES)      # free reshape (no copy)
        t2 = t.reshape(rows, LANES)

        def in_index_map(c, i):
            # Clamp out-of-range (duplicate) steps onto the last real block;
            # the kernel skips their contribution with a scalar pl.when.
            return (jnp.minimum(c * steps_per_core + i, full_steps - 1), 0)

        kernel = functools.partial(
            _charbonnier_kernel,
            eps=float(eps), row_tile=row_tile, chunk=chunk, unroll=unroll,
            steps_per_core=steps_per_core, full_steps=full_steps)

        partials = pl.pallas_call(
            kernel,
            out_shape=jax.ShapeDtypeStruct((ncores, 8, LANES), jnp.float32),
            grid_spec=pltpu.PrefetchScalarGridSpec(
                num_scalar_prefetch=0,
                grid=(ncores, steps_per_core),
                in_specs=[
                    pl.BlockSpec((row_tile, LANES), in_index_map),
                    pl.BlockSpec((row_tile, LANES), in_index_map),
                ],
                out_specs=pl.BlockSpec((1, 8, LANES), lambda c, i: (c, 0, 0)),
                scratch_shapes=[pltpu.VMEM((8, LANES), jnp.float32)],
            ),
            compiler_params=pltpu.CompilerParams(
                dimension_semantics=("parallel", "arbitrary"),
                vmem_limit_bytes=VMEM_LIMIT_BYTES,
            ),
        )(p2, t2)

        # Single tiny cross-lane reduce, outside the hot loop.
        total_sum = jnp.sum(partials)

        # Leftover rows (< row_tile of them): small jnp slice instead of a
        # partial / masked kernel block.
        if kernel_rows < rows:
            total_sum = total_sum + _plain_charbonnier_sum(
                p2[kernel_rows:], t2[kernel_rows:], eps)

    if n_pad:
        # Each padded zero contributed exactly sqrt(0 + eps); remove analytically.
        total_sum = total_sum - jnp.float32(n_pad) * jnp.sqrt(jnp.float32(eps))

    return total_sum / jnp.float32(total)


def charbonnier_loss_ref(pred, target, eps):
    return jnp.mean(jnp.sqrt((pred - target) ** 2 + eps))


if __name__ == "__main__":
    eps = 1e-6
    key = jax.random.PRNGKey(0)

    cases = [
        ((2, 4, 16, 16), jnp.float32),    # small lane-aligned NCHW, single step
        ((2, 3, 7, 5), jnp.float32),      # ragged total -> pad-correction / jnp path
        ((8, 8, 128, 130), jnp.float32),  # big 8192-row tile + jnp row tail
        ((3, 4, 512, 512), jnp.float32),  # 3 full steps: core split + clamped duplicate
        ((2, 8, 64, 64), jnp.bfloat16),   # native-dtype (bf16) streaming
    ]
    for shape, dtype in cases:
        key, k1, k2 = jax.random.split(key, 3)
        pred = jax.random.normal(k1, shape, dtype=jnp.float32).astype(dtype)
        target = jax.random.normal(k2, shape, dtype=jnp.float32).astype(dtype)

        loss = jax.block_until_ready(charbonnier_loss(pred, target, eps))
        ref = charbonnier_loss_ref(pred.astype(jnp.float32),
                                   target.astype(jnp.float32), eps)
        assert jnp.allclose(loss, ref, rtol=1e-4, atol=1e-6), (shape, dtype, loss, ref)

    print("KERNEL_OK")
</pallas_src>

<mosaic_0001>
module attributes {stable_mosaic.version = 11 : i64} {
  func.func @_charbonnier_kernel(%arg0: i32, %arg1: i32, %arg2: memref<16x128xf32, #tpu.memory_space<vmem>>, %arg3: memref<16x128xf32, #tpu.memory_space<vmem>>, %arg4: memref<1x8x128xf32, #tpu.memory_space<vmem>>, %arg5: memref<8x128xf32, #tpu.memory_space<vmem>>) attributes {dimension_semantics = [#tpu.dimension_semantics<parallel>, #tpu.dimension_semantics<arbitrary>], iteration_bounds = array<i64: 1, 1>, scalar_prefetch = 0 : i64, scratch_operands = 1 : i64, tpu.core_type = #tpu.core_type<tc>, window_params = [{transform_indices = @transform_0, window_bounds = array<i64: 16, 128>}, {transform_indices = @transform_1, window_bounds = array<i64: 16, 128>}, {transform_indices = @transform_2, window_bounds = array<i64: 1, 8, 128>}]} {
    %c0_i32 = arith.constant 0 : i32
    %0 = arith.cmpi eq, %arg1, %c0_i32 : i32
    %1 = arith.extui %0 : i1 to i32
    %c0_i32_0 = arith.constant 0 : i32
    %2 = arith.cmpi ne, %1, %c0_i32_0 : i32
    scf.if %2 {
      %cst = arith.constant 0.000000e+00 : f32
      %11 = vector.broadcast %cst : f32 to vector<8x128xf32>
      %c0 = arith.constant 0 : index
      %c0_5 = arith.constant 0 : index
      %12 = vector.load %arg5[%c0, %c0_5] : memref<8x128xf32, #tpu.memory_space<vmem>>, vector<8x128xf32>
      tpu.vector_store %arg5[%c0, %c0_5], %11 {strides = array<i32>} : memref<8x128xf32, #tpu.memory_space<vmem>>, vector<8x128xf32>,
    } else {
    }
    %c1_i32 = arith.constant 1 : i32
    %3 = arith.muli %arg0, %c1_i32 : i32
    %4 = arith.addi %3, %arg1 : i32
    %c1_i32_1 = arith.constant 1 : i32
    %5 = arith.cmpi slt, %4, %c1_i32_1 : i32
    %6 = arith.extui %5 : i1 to i32
    %c0_i32_2 = arith.constant 0 : i32
    %7 = arith.cmpi ne, %6, %c0_i32_2 : i32
    scf.if %7 {
      %c0_i32_5 = arith.constant 0 : i32
      %c8_i32 = arith.constant 8 : i32
      %11 = arith.muli %c0_i32_5, %c8_i32 : i32
      %12 = tpu.assume_multiple %11, 8 : i32
      %13 = arith.index_cast %12 : i32 to index
      %c0 = arith.constant 0 : index
      %14 = vector.load %arg2[%13, %c0] : memref<16x128xf32, #tpu.memory_space<vmem>>, vector<8x128xf32>
      %15 = arith.index_cast %12 : i32 to index
      %c0_6 = arith.constant 0 : index
      %16 = vector.load %arg3[%15, %c0_6] : memref<16x128xf32, #tpu.memory_space<vmem>>, vector<8x128xf32>
      %17 = arith.subf %14, %16 : vector<8x128xf32>
      %18 = arith.mulf %17, %17 : vector<8x128xf32>
      %cst = arith.constant 9.99999997E-7 : f32
      %19 = vector.broadcast %cst : f32 to vector<8x128xf32>
      %20 = arith.addf %18, %19 : vector<8x128xf32>
      %21 = math.sqrt %20 : vector<8x128xf32>
      %c0_7 = arith.constant 0 : index
      %c0_8 = arith.constant 0 : index
      %22 = vector.load %arg5[%c0_7, %c0_8] : memref<8x128xf32, #tpu.memory_space<vmem>>, vector<8x128xf32>
      %23 = vector.shape_cast %21 : vector<8x128xf32> to vector<1x8x128xf32>
      %cst_9 = arith.constant dense<0.000000e+00> : vector<8x128xf32>
      %24 = vector.multi_reduction <add>, %23, %cst_9 [0] : vector<1x8x128xf32> to vector<8x128xf32>
      %25 = arith.addf %22, %24 : vector<8x128xf32>
      %c0_10 = arith.constant 0 : index
      %c0_11 = arith.constant 0 : index
      %26 = vector.load %arg5[%c0_10, %c0_11] : memref<8x128xf32, #tpu.memory_space<vmem>>, vector<8x128xf32>
      tpu.vector_store %arg5[%c0_10, %c0_11], %25 {strides = array<i32>} : memref<8x128xf32, #tpu.memory_space<vmem>>, vector<8x128xf32>,
      %c1_i32_12 = arith.constant 1 : i32
      %c8_i32_13 = arith.constant 8 : i32
      %27 = arith.muli %c1_i32_12, %c8_i32_13 : i32
      %28 = tpu.assume_multiple %27, 8 : i32
      %29 = arith.index_cast %28 : i32 to index
      %c0_14 = arith.constant 0 : index
      %30 = vector.load %arg2[%29, %c0_14] : memref<16x128xf32, #tpu.memory_space<vmem>>, vector<8x128xf32>
      %31 = arith.index_cast %28 : i32 to index
      %c0_15 = arith.constant 0 : index
      %32 = vector.load %arg3[%31, %c0_15] : memref<16x128xf32, #tpu.memory_space<vmem>>, vector<8x128xf32>
      %33 = arith.subf %30, %32 : vector<8x128xf32>
      %34 = arith.mulf %33, %33 : vector<8x128xf32>
      %cst_16 = arith.constant 9.99999997E-7 : f32
      %35 = vector.broadcast %cst_16 : f32 to vector<8x128xf32>
      %36 = arith.addf %34, %35 : vector<8x128xf32>
      %37 = math.sqrt %36 : vector<8x128xf32>
      %c0_17 = arith.constant 0 : index
      %c0_18 = arith.constant 0 : index
      %38 = vector.load %arg5[%c0_17, %c0_18] : memref<8x128xf32, #tpu.memory_space<vmem>>, vector<8x128xf32>
      %39 = vector.shape_cast %37 : vector<8x128xf32> to vector<1x8x128xf32>
      %cst_19 = arith.constant dense<0.000000e+00> : vector<8x128xf32>
      %40 = vector.multi_reduction <add>, %39, %cst_19 [0] : vector<1x8x128xf32> to vector<8x128xf32>
      %41 = arith.addf %38, %40 : vector<8x128xf32>
      %c0_20 = arith.constant 0 : index
      %c0_21 = arith.constant 0 : index
      %42 = vector.load %arg5[%c0_20, %c0_21] : memref<8x128xf32, #tpu.memory_space<vmem>>, vector<8x128xf32>
      tpu.vector_store %arg5[%c0_20, %c0_21], %41 {strides = array<i32>} : memref<8x128xf32, #tpu.memory_space<vmem>>, vector<8x128xf32>,
      %c2_i32 = arith.constant 2 : i32
    } else {
    }
    %c0_i32_3 = arith.constant 0 : i32
    %8 = arith.cmpi eq, %arg1, %c0_i32_3 : i32
    %9 = arith.extui %8 : i1 to i32
    %c0_i32_4 = arith.constant 0 : i32
    %10 = arith.cmpi ne, %9, %c0_i32_4 : i32
    scf.if %10 {
      %c0 = arith.constant 0 : index
      %c0_5 = arith.constant 0 : index
      %11 = vector.load %arg5[%c0, %c0_5] : memref<8x128xf32, #tpu.memory_space<vmem>>, vector<8x128xf32>
      %12 = vector.shape_cast %11 : vector<8x128xf32> to vector<1x8x128xf32>
      %c0_6 = arith.constant 0 : index
      %c0_7 = arith.constant 0 : index
      %c0_8 = arith.constant 0 : index
      %13 = vector.load %arg4[%c0_6, %c0_7, %c0_8] : memref<1x8x128xf32, #tpu.memory_space<vmem>>, vector<1x8x128xf32>
      tpu.vector_store %arg4[%c0_6, %c0_7, %c0_8], %12 {strides = array<i32>} : memref<1x8x128xf32, #tpu.memory_space<vmem>>, vector<1x8x128xf32>,
    } else {
    }
    return
  }
  func.func @transform_0(%arg0: i32, %arg1: i32) -> (i32, i32) {
    %c1_i32 = arith.constant 1 : i32
    %0 = arith.muli %arg0, %c1_i32 : i32
    %1 = arith.addi %0, %arg1 : i32
    %c0_i32 = arith.constant 0 : i32
    %2 = arith.minsi %1, %c0_i32 : i32
    %c0_i32_0 = arith.constant 0 : i32
    %c0_i32_1 = arith.constant 0 : i32
    return %2, %c0_i32_0 : i32, i32
  }
  func.func @transform_1(%arg0: i32, %arg1: i32) -> (i32, i32) {
    %c1_i32 = arith.constant 1 : i32
    %0 = arith.muli %arg0, %c1_i32 : i32
    %1 = arith.addi %0, %arg1 : i32
    %c0_i32 = arith.constant 0 : i32
    %2 = arith.minsi %1, %c0_i32 : i32
    %c0_i32_0 = arith.constant 0 : i32
    %c0_i32_1 = arith.constant 0 : i32
    return %2, %c0_i32_0 : i32, i32
  }
  func.func @transform_2(%arg0: i32, %arg1: i32) -> (i32, i32, i32) {
    %c0_i32 = arith.constant 0 : i32
    %c0_i32_0 = arith.constant 0 : i32
    %c0_i32_1 = arith.constant 0 : i32
    return %arg0, %c0_i32, %c0_i32_0 : i32, i32, i32
  }
}

</mosaic_0001>

<bundles_post_ra>
// kernel: tpu_custom_call.1
= control target key start
LH: loop header
LB: loop body
LE: loop exit
PB: predicated region body
PF: predicated region fallthrough
CT: control target
= control target key end

     0   :  { %7 = vsyncpa [#allocation4], 0  ;;  %s266_s0 = inlined_call_operand.hbm [shape: f32[16,128], index: 0, kind: input, shape index: {}]   ;;  %s267_s1 = inlined_call_operand.hbm [shape: f32[16,128], index: 1, kind: input, shape index: {}]   ;;  %s268_s2 = inlined_call_operand.hbm [shape: f32[1,8,128], index: 2, kind: output, shape index: {}]  }
   0x1   :  { %8 = vsyncpa [#allocation7], 0 }
   0x2   :  { %9 = vsyncpa [#allocation5], 0  ;;  %s210_s9 = smov [#allocation3]   ;;  %s138_s13 = scalar_lea.hbm %s266_s0, 256 }
   0x3   :  { %s21_s10 = sshll.u32 %s210_s9, 4  ;;  %p139_p0 = scmp.ne.s32.totalorder %s266_s0, %s138_s13  ;;  %s22_s10 = int_to_ptr.vmem [resolvable:$true] %s21_s10 }
   0x4   :  { %p142_p1 = scmp.lt.u32.totalorder %s138_s13, %s266_s0 }
   0x6   :  { %p144_p2 = pnand %p142_p1, %p139_p0 }
   0x8   :  { %147 = shalt.err (!%p144_p2)
}
   0x9   :  { %s148_s18 = scalar_lea.vmem %s22_s10, 256  ;;  %p153_p4 = scmp.lt.s32.totalorder %s22_s10, %s22_s10 }
   0xa   :  { %p149_p3 = scmp.ne.s32.totalorder %s22_s10, %s148_s18  ;;  %p154_p5 = scmp.lt.s32.totalorder %s148_s18, %s148_s18 }
   0xc   :  { %p155_p6 = por %p154_p5, %p153_p4 }
   0xe   :  { %p156_p7 = pnand %p155_p6, %p149_p3 }
  0x10   :  { %159 = shalt.err (!%p156_p7)
}
  0x11   :  { %s211_s19 = smov 128   ;;  %s212_s20 = smov 8  }
  0x12   :  { %27 = dma.hbm_to_vmem [thread:$0]  %s266_s0, 256, %s22_s10, [#allocation4], %s211_s19, %s211_s19, %s212_s20  }
  0x13   :  { %s213_s23 = smov [#allocation6]   ;;  %s160_s27 = scalar_lea.hbm %s267_s1, 256 }
  0x14   :  { %s39_s24 = sshll.u32 %s213_s23, 4  ;;  %p161_p8 = scmp.ne.s32.totalorder %s267_s1, %s160_s27  ;;  %s40_s24 = int_to_ptr.vmem [resolvable:$true] %s39_s24 }
  0x15   :  { %p164_p9 = scmp.lt.u32.totalorder %s160_s27, %s267_s1 }
  0x17   :  { %p166_p10 = pnand %p164_p9, %p161_p8 }
  0x19   :  { %169 = shalt.err (!%p166_p10)
}
  0x1a   :  { %s170_s4 = scalar_lea.vmem %s40_s24, 256  ;;  %p175_p12 = scmp.lt.s32.totalorder %s40_s24, %s40_s24 }
  0x1b   :  { %p171_p11 = scmp.ne.s32.totalorder %s40_s24, %s170_s4  ;;  %p176_p13 = scmp.lt.s32.totalorder %s170_s4, %s170_s4 }
  0x1d   :  { %p177_p0 = por %p176_p13, %p175_p12 }
  0x1f   :  { %p178_p1 = pnand %p177_p0, %p171_p11 }
  0x21   :  { %181 = shalt.err (!%p178_p1)
}
  0x22   :  { %45 = dma.hbm_to_vmem [thread:$0]  %s267_s1, 256, %s40_s24, [#allocation7], %s211_s19, %s211_s19, %s212_s20  }
  0x23   :  { %204 = dma.done.wait [#allocation4], 256  }
  0x24   :  { %205 = vsyncadd [#allocation4], 4294967040 }
  0x25   :  { %206 = dma.done.wait [#allocation7], 256  }
  0x26   :  { %207 = vsyncadd [#allocation7], 4294967040  ;;  %v70_v0 = vld [vmem:[#allocation3] sm:$0xff]  ;;  %v71_v1 = vld [vmem:[#allocation6] sm:$0xff]  ;;  %s214_s1 = smov [#allocation8]  }
  0x27   :  { %v87_v2 = vld [vmem:[#allocation3 + $0x8] sm:$0xff]  ;;  %v72_v3 = vsub.f32 %v70_v0, %v71_v1  ;;  %v89_v4 = vld [vmem:[#allocation6 + $0x8] sm:$0xff]  ;;  %s115_s6 = sshll.u32 %s214_s1, 4  ;;  %s116_s6 = int_to_ptr.vmem [resolvable:$true] %s115_s6 }
  0x28   :  { %v90_v5 = vsub.f32 %v87_v2, %v89_v4  ;;  %s182_s7 = scalar_lea.vmem %s116_s6, 128  ;;  %p187_p3 = scmp.lt.s32.totalorder %s116_s6, %s116_s6 }
  0x29   :  { %v73_v6 = vmul.f32 %v72_v3, %v72_v3  ;;  %p183_p2 = scmp.ne.s32.totalorder %s116_s6, %s182_s7  ;;  %p188_p4 = scmp.lt.s32.totalorder %s182_s7, %s182_s7 }
  0x2a   :  { %v91_v7 = vmul.f32 %v90_v5, %v90_v5 }
  0x2b   :  { %v74_v8 = vadd.f32 1e-06, %v73_v6  ;;  %p189_p5 = por %p188_p4, %p187_p3 }
  0x2c   :  { %v92_v9 = vadd.f32 1e-06, %v91_v7 }
  0x2d   :  { %134 = vrsqrt.f32 %v74_v8  ;;  %vm77_vm0 = vcmp.eq.f32.partialorder %v74_v8, inf  ;;  %v80_v11 = vand.u32 2147483648, %v74_v8  ;;  %vm79_vm1 = vcmp.eq.f32.partialorder %v74_v8, 0.0  ;;  %p190_p6 = pnand %p189_p5, %p183_p2 }
  0x2e   :  { %136 = vrsqrt.f32 %v92_v9  ;;  %vm95_vm2 = vcmp.eq.f32.partialorder %v92_v9, inf  ;;  %v98_v14 = vand.u32 2147483648, %v92_v9  ;;  %vm97_vm3 = vcmp.eq.f32.partialorder %v92_v9, 0.0 }
  0x37   :  { %v135_v10 = vpop.eup %134 }
  0x38   :  { %v137_v12 = vpop.eup %136  ;;  %v76_v13 = vmul.f32 %v135_v10, %v74_v8 }
  0x39   :  { %v94_v15 = vmul.f32 %v137_v12, %v92_v9 }
  0x3a   :  { %v78_v16 = vsel %vm77_vm0, %v74_v8, %v76_v13 }
  0x3b   :  { %v81_v17 = vsel %vm79_vm1, %v80_v11, %v78_v16  ;;  %v96_v18 = vsel %vm95_vm2, %v92_v9, %v94_v15 }
  0x3c   :  { %v99_v19 = vsel %vm97_vm3, %v98_v14, %v96_v18 }
  0x3d   :  { %v102_v20 = vadd.f32 %v99_v19, %v81_v17 }
  0x3f   :  { %108 = vst [vmem:[#allocation8] sm:$0xff] %v102_v20 }
  0x40   :  { %193 = shalt.err (!%p190_p6)
}
  0x41   :  { %s194_s10 = scalar_lea.hbm %s268_s2, 128 }
  0x42   :  { %p195_p7 = scmp.ne.s32.totalorder %s268_s2, %s194_s10  ;;  %p198_p8 = scmp.lt.u32.totalorder %s194_s10, %s268_s2 }
  0x44   :  { %p200_p9 = pnand %p198_p8, %p195_p7 }
  0x46   :  { %203 = shalt.err (!%p200_p9)
}
  0x47   :  { %118 = dma.vmem_to_hbm [thread:$0]  %s116_s6, 128, %s268_s2, [#allocation5]  }
  0x48   :  { %208 = dma.done.wait [#allocation5], 128  }
  0x49   :  { %209 = vsyncadd [#allocation5], 4294967168 }
  0x4a   :  { %122 = vsyncpa [#allocation4], 1 }
  0x4b   :  { %123 = vsyncpa [#allocation7], 1 }
  0x4c   :  { %124 = vsyncpa [#allocation5], 1 }

</bundles_post_ra>
